<compile_context>
chip_gen: v5e
topology: v5e:2x2
jax: 0.10.0
libtpu: 0.0.40
codegen_flags: <defaults>
</compile_context>

<pallas_src>
import jax
import jax.numpy as jnp
from jax.experimental import pallas as pl
from jax.experimental.pallas import tpu as pltpu
import numpy as np


# ----------------------------------------------------------------------------
# Degree / mask construction (mirrors MaskedLinear._get_mask_and_degrees for
# hidden layers: random_mask=False, is_output=False).
# ----------------------------------------------------------------------------
def _hidden_degrees(out_features, autoregressive_features):
    max_ = max(1, autoregressive_features - 1)
    min_ = min(1, autoregressive_features - 1)
    return np.arange(out_features) % max_ + min_


def _hidden_mask(in_degrees, out_features, autoregressive_features):
    out_degrees = _hidden_degrees(out_features, autoregressive_features)
    # mask[o, i] = 1.0 if out_degrees[o] >= in_degrees[i]
    mask = (out_degrees[:, None] >= np.asarray(in_degrees)[None, :]).astype(np.float32)
    return mask, out_degrees


def _round_up(x, m):
    return ((x + m - 1) // m) * m


def _pick_batch_tile(B, max_tile):
    """Multiple-of-8 batch tile that (a) caps at max_tile, (b) yields >= 2 grid
    steps when B allows (so v7x megacore splits work), (c) minimises batch
    padding for that step count (e.g. B=130 -> TB=72, not 256)."""
    if B <= 8:
        return 8
    cap = min(max_tile, _round_up(B, 8))
    if B >= 16:  # ensure at least two grid steps for the parallel batch axis
        cap = min(cap, _round_up(-(-B // 2), 8))
    cap = max(cap, 8)
    n_steps = -(-B // cap)                       # minimal step count at this cap
    tb = _round_up(-(-B // n_steps), 8)          # smallest tile achieving it
    return max(8, min(tb, cap))


# ----------------------------------------------------------------------------
# Pallas kernel: one batch tile of the residual block.
#   x_ref   [TB, Fp]  f32
#   ctx_ref [TB, Cp]  f32
#   w0m_ref [Fp, Fp]  compute dtype   ((W0*M0)^T, zero-padded)
#   wct_ref [Cp, Fp]  compute dtype   (Wc^T, zero-padded)
#   w1m_ref [Fp, Fp]  compute dtype   ((W1*M1)^T, zero-padded)
#   b_ref   [2,  Fp]  f32             (row 0 = b0 + bc, row 1 = b1)
#   out_ref [TB, Fp]  f32
# ----------------------------------------------------------------------------
def _masked_residual_block_kernel(x_ref, ctx_ref, w0m_ref, wct_ref, w1m_ref,
                                  b_ref, out_ref):
    cd = w0m_ref.dtype                       # MXU compute dtype (bf16 by default)

    x = x_ref[...]                           # f32
    t = jnp.maximum(x, 0.0)                  # relu on the VPU, f32

    b = b_ref[...]                           # (2, Fp) f32

    # masked linear 0 (mask already folded into weight) + context linear,
    # both with f32 MXU accumulation.
    t = jnp.dot(t.astype(cd), w0m_ref[...], preferred_element_type=jnp.float32)
    t = t + jnp.dot(ctx_ref[...].astype(cd), wct_ref[...],
                    preferred_element_type=jnp.float32)
    t = t + b[0:1, :]                        # fused b0 + bc

    t = jnp.maximum(t, 0.0)                  # relu; dropout p=0.0 is identity
    # TODO(synk): use_batch_norm=True and dropout_p>0 branches are not implemented.
    # TODO(synk): context=None path is not implemented (kernel requires context).

    t = jnp.dot(t.astype(cd), w1m_ref[...],
                preferred_element_type=jnp.float32) + b[1:2, :]

    out_ref[...] = x + t


# ----------------------------------------------------------------------------
# One-time static preprocessing (hoisted out of the per-call path).
# ----------------------------------------------------------------------------
def prepare_masked_residual_params(params, *, compute_dtype=jnp.bfloat16):
    """Fold the autoregressive masks into the weights, transpose to [in, out],
    zero-pad to lane (128) multiples, cast the MXU operands to `compute_dtype`
    and fuse the biases into a single (2, Fp) f32 operand.  Call once at
    parameter setup time."""
    F = params["w0"].shape[0]
    C = params["wc"].shape[1]
    Fp = _round_up(F, 128)
    Cp = _round_up(C, 128)
    f32 = jnp.float32

    w0m = jnp.zeros((Fp, Fp), compute_dtype).at[:F, :F].set(
        (params["w0"] * params["m0"]).T.astype(compute_dtype))
    w1m = jnp.zeros((Fp, Fp), compute_dtype).at[:F, :F].set(
        (params["w1"] * params["m1"]).T.astype(compute_dtype))
    wct = jnp.zeros((Cp, Fp), compute_dtype).at[:C, :F].set(
        params["wc"].T.astype(compute_dtype))
    bias = jnp.zeros((2, Fp), f32)
    bias = bias.at[0, :F].set((params["b0"] + params["bc"]).astype(f32))
    bias = bias.at[1, :F].set(params["b1"].astype(f32))

    return {"w0m": w0m, "wct": wct, "w1m": w1m, "bias": bias,
            "F": F, "C": C, "Fp": Fp, "Cp": Cp,
            "compute_dtype": jnp.dtype(compute_dtype)}


# ----------------------------------------------------------------------------
# Wrapper: lane/sublane alignment (fast path when already aligned), batch grid,
# derived VMEM budget, single-buffered resident weights.
# ----------------------------------------------------------------------------
def masked_residual_block(x, context, prepared, *, batch_tile=512):
    B, F = x.shape
    C = context.shape[1]
    assert F == prepared["F"] and C == prepared["C"]
    Fp, Cp = prepared["Fp"], prepared["Cp"]
    cdtype = prepared["compute_dtype"]
    f32 = jnp.float32

    TB = _pick_batch_tile(B, batch_tile)
    Bp = _round_up(B, TB)
    grid = (Bp // TB,)

    # Activation padding: skip the extra HBM round-trip when already aligned.
    if Bp != B or Fp != F:
        xp = jnp.zeros((Bp, Fp), f32).at[:B, :F].set(x.astype(f32))
    else:
        xp = x.astype(f32)
    if Bp != B or Cp != C:
        cp = jnp.zeros((Bp, Cp), f32).at[:B, :C].set(context.astype(f32))
    else:
        cp = context.astype(f32)

    # --- VMEM budget from actual buffer sizes -------------------------------
    wbytes = cdtype.itemsize
    weight_bytes = wbytes * (2 * Fp * Fp + Cp * Fp) + 4 * 2 * Fp   # one buffer
    act_bytes = 2 * 4 * TB * (2 * Fp + Cp)      # double-buffered x / out / ctx
    scratch_bytes = 2 * 4 * TB * Fp             # in-kernel f32 temporaries (rough)
    headroom = 4 << 20
    try:
        vmem_cap = int(pltpu.get_tpu_info().vmem_capacity_bytes)
    except Exception:
        vmem_cap = 64 * 1024 * 1024             # assume v7x per-core (worst case)
    cap = (vmem_cap * 3) // 4

    if weight_bytes + act_bytes + scratch_bytes + headroom > cap:
        # TODO(synk): for very large hidden widths, stream 512-wide output-column
        # tiles of w0m/wct/w1m over an extra grid axis instead of keeping the
        # full weights resident.
        raise ValueError(
            "Resident weights + tiles exceed the VMEM budget; use a bf16 "
            "compute_dtype or a smaller batch_tile.")

    cost = pl.CostEstimate(
        flops=2 * B * F * (2 * F + C),          # real (unpadded) work, advisory
        transcendentals=0,
        bytes_accessed=(wbytes * (2 * Fp * Fp + Cp * Fp) + 4 * 2 * Fp
                        + 4 * Bp * (2 * Fp + Cp)),
    )

    def run(weight_pipeline_mode, weight_buf_count):
        vl = weight_bytes * weight_buf_count + act_bytes + scratch_bytes + headroom
        vl = int(max(min(vl, cap), 16 * 1024 * 1024))

        def wspec(shape):
            if weight_pipeline_mode is None:
                return pl.BlockSpec(shape, lambda i: (0, 0))
            return pl.BlockSpec(shape, lambda i: (0, 0),
                                pipeline_mode=weight_pipeline_mode)

        in_specs = [
            pl.BlockSpec((TB, Fp), lambda i: (i, 0)),   # x        (tiled over batch)
            pl.BlockSpec((TB, Cp), lambda i: (i, 0)),   # context  (tiled over batch)
            wspec((Fp, Fp)),                            # (W0*M0)^T  (resident)
            wspec((Cp, Fp)),                            # Wc^T       (resident)
            wspec((Fp, Fp)),                            # (W1*M1)^T  (resident)
            wspec((2, Fp)),                             # [b0+bc ; b1] (resident)
        ]
        out_specs = pl.BlockSpec((TB, Fp), lambda i: (i, 0))

        return pl.pallas_call(
            _masked_residual_block_kernel,
            out_shape=jax.ShapeDtypeStruct((Bp, Fp), jnp.float32),
            grid=grid,
            in_specs=in_specs,
            out_specs=out_specs,
            compiler_params=pltpu.CompilerParams(
                dimension_semantics=("parallel",),      # batch axis -> megacore
                vmem_limit_bytes=vl),
            cost_estimate=cost,
        )(xp, cp, prepared["w0m"], prepared["wct"], prepared["w1m"],
          prepared["bias"])

    try:
        # Resident operands (constant index_map) only need a single buffer.
        out = jax.block_until_ready(run(pl.Buffered(buffer_count=1), 1))
    except Exception:
        # Fallback: default double buffering (older jax / unsupported count).
        out = run(None, 2)

    if Bp != B or Fp != F:
        out = out[:B, :F]
    return out


# ----------------------------------------------------------------------------
# Pure-JAX reference for correctness checking.
# ----------------------------------------------------------------------------
def masked_residual_block_ref(x, context, params):
    t = jnp.maximum(x, 0.0)
    t = t @ (params["w0"] * params["m0"]).T + params["b0"]
    t = t + context @ params["wc"].T + params["bc"]
    t = jnp.maximum(t, 0.0)
    t = t @ (params["w1"] * params["m1"]).T + params["b1"]
    return x + t


if __name__ == "__main__":
    # Small shapes consistent with typical MADE usage:
    #   autoregressive (data) dim = 8, hidden features = 32, context = 16, batch = 8.
    B = 8
    features = 32                 # = len(in_degrees)
    autoregressive_features = 8
    context_features = 16

    # in_degrees: degrees of the preceding hidden layer (as MADE feeds them in).
    in_degrees = _hidden_degrees(features, autoregressive_features)

    # Masks for the two hidden masked-linear layers.
    m0, deg0 = _hidden_mask(in_degrees, features, autoregressive_features)
    m1, deg1 = _hidden_mask(deg0, features, autoregressive_features)
    assert np.all(deg1 >= in_degrees)   # the module's residual-degree check

    # Deterministic parameter init (shapes from the module's __init__).
    key = jax.random.PRNGKey(0)
    keys = jax.random.split(key, 8)
    bound_f = 1.0 / np.sqrt(features)
    bound_c = 1.0 / np.sqrt(context_features)
    params = {
        "w0": jax.random.uniform(keys[0], (features, features), jnp.float32,
                                 -bound_f, bound_f),
        "b0": jax.random.uniform(keys[1], (features,), jnp.float32,
                                 -bound_f, bound_f),
        "wc": jax.random.uniform(keys[2], (features, context_features), jnp.float32,
                                 -bound_c, bound_c),
        "bc": jax.random.uniform(keys[3], (features,), jnp.float32,
                                 -bound_c, bound_c),
        # zero_initialization=True -> last layer weight/bias ~ U(-1e-3, 1e-3)
        "w1": jax.random.uniform(keys[4], (features, features), jnp.float32,
                                 -1e-3, 1e-3),
        "b1": jax.random.uniform(keys[5], (features,), jnp.float32,
                                 -1e-3, 1e-3),
        "m0": jnp.asarray(m0),
        "m1": jnp.asarray(m1),
    }

    x = jax.random.normal(keys[6], (B, features), jnp.float32)
    context = jax.random.normal(keys[7], (B, context_features), jnp.float32)

    ref = masked_residual_block_ref(x, context, params)

    # Default (bf16 MXU operands, f32 accumulation) — production path.
    prep_bf16 = prepare_masked_residual_params(params, compute_dtype=jnp.bfloat16)
    out_bf16 = jax.block_until_ready(masked_residual_block(x, context, prep_bf16))
    np.testing.assert_allclose(np.asarray(out_bf16), np.asarray(ref),
                               rtol=2e-2, atol=2e-2)

    # f32 path for a tight numerical check.
    prep_f32 = prepare_masked_residual_params(params, compute_dtype=jnp.float32)
    out_f32 = jax.block_until_ready(masked_residual_block(x, context, prep_f32))
    np.testing.assert_allclose(np.asarray(out_f32), np.asarray(ref),
                               rtol=1e-5, atol=1e-5)

    print("KERNEL_OK")
</pallas_src>

<mosaic_0001>
module attributes {stable_mosaic.version = 11 : i64} {
  func.func @_masked_residual_block_kernel(%arg0: i32, %arg1: memref<8x128xf32, #tpu.memory_space<vmem>>, %arg2: memref<8x128xf32, #tpu.memory_space<vmem>>, %arg3: memref<128x128xbf16, #tpu.memory_space<vmem>>, %arg4: memref<128x128xbf16, #tpu.memory_space<vmem>>, %arg5: memref<128x128xbf16, #tpu.memory_space<vmem>>, %arg6: memref<2x128xf32, #tpu.memory_space<vmem>>, %arg7: memref<8x128xf32, #tpu.memory_space<vmem>>) attributes {dimension_semantics = [#tpu.dimension_semantics<parallel>], iteration_bounds = array<i64: 1>, scalar_prefetch = 0 : i64, scratch_operands = 0 : i64, tpu.core_type = #tpu.core_type<tc>, window_params = [{transform_indices = @transform_0, window_bounds = array<i64: 8, 128>}, {transform_indices = @transform_1, window_bounds = array<i64: 8, 128>}, {pipeline_mode = #tpu.pipeline_mode<synchronous>, transform_indices = @transform_2, window_bounds = array<i64: 128, 128>}, {pipeline_mode = #tpu.pipeline_mode<synchronous>, transform_indices = @transform_3, window_bounds = array<i64: 128, 128>}, {pipeline_mode = #tpu.pipeline_mode<synchronous>, transform_indices = @transform_4, window_bounds = array<i64: 128, 128>}, {pipeline_mode = #tpu.pipeline_mode<synchronous>, transform_indices = @transform_5, window_bounds = array<i64: 2, 128>}, {transform_indices = @transform_6, window_bounds = array<i64: 8, 128>}]} {
    %c0 = arith.constant 0 : index
    %c0_0 = arith.constant 0 : index
    %0 = vector.load %arg1[%c0, %c0_0] : memref<8x128xf32, #tpu.memory_space<vmem>>, vector<8x128xf32>
    %cst = arith.constant 0.000000e+00 : f32
    %1 = vector.broadcast %cst : f32 to vector<8x128xf32>
    %2 = arith.maximumf %0, %1 : vector<8x128xf32>
    %c0_1 = arith.constant 0 : index
    %c0_2 = arith.constant 0 : index
    %3 = vector.load %arg6[%c0_1, %c0_2] : memref<2x128xf32, #tpu.memory_space<vmem>>, vector<2x128xf32>
    %4 = arith.truncf %2 : vector<8x128xf32> to vector<8x128xbf16>
    %c0_3 = arith.constant 0 : index
    %c0_4 = arith.constant 0 : index
    %5 = vector.load %arg3[%c0_3, %c0_4] : memref<128x128xbf16, #tpu.memory_space<vmem>>, vector<128x128xbf16>
    %cst_5 = arith.constant dense<0.000000e+00> : vector<8x128xf32>
    %6 = tpu.matmul %4, %5, %cst_5 {dimension_numbers = #tpu.dot_dimension_numbers<[1], [0], [0], [1], [0, 0, 1, 1], [], []>} : vector<8x128xbf16>, vector<128x128xbf16>, vector<8x128xf32> -> vector<8x128xf32>
    %c0_6 = arith.constant 0 : index
    %c0_7 = arith.constant 0 : index
    %7 = vector.load %arg2[%c0_6, %c0_7] : memref<8x128xf32, #tpu.memory_space<vmem>>, vector<8x128xf32>
    %8 = arith.truncf %7 : vector<8x128xf32> to vector<8x128xbf16>
    %c0_8 = arith.constant 0 : index
    %c0_9 = arith.constant 0 : index
    %9 = vector.load %arg4[%c0_8, %c0_9] : memref<128x128xbf16, #tpu.memory_space<vmem>>, vector<128x128xbf16>
    %cst_10 = arith.constant dense<0.000000e+00> : vector<8x128xf32>
    %10 = tpu.matmul %8, %9, %cst_10 {dimension_numbers = #tpu.dot_dimension_numbers<[1], [0], [0], [1], [0, 0, 1, 1], [], []>} : vector<8x128xbf16>, vector<128x128xbf16>, vector<8x128xf32> -> vector<8x128xf32>
    %11 = arith.addf %6, %10 : vector<8x128xf32>
    %12 = vector.extract_strided_slice %3 {offsets = [0, 0], sizes = [1, 128], strides = [1, 1]} : vector<2x128xf32> to vector<1x128xf32>
    %13 = vector.broadcast %12 : vector<1x128xf32> to vector<8x128xf32>
    %14 = arith.addf %11, %13 : vector<8x128xf32>
    %cst_11 = arith.constant 0.000000e+00 : f32
    %15 = vector.broadcast %cst_11 : f32 to vector<8x128xf32>
    %16 = arith.maximumf %14, %15 : vector<8x128xf32>
    %17 = arith.truncf %16 : vector<8x128xf32> to vector<8x128xbf16>
    %c0_12 = arith.constant 0 : index
    %c0_13 = arith.constant 0 : index
    %18 = vector.load %arg5[%c0_12, %c0_13] : memref<128x128xbf16, #tpu.memory_space<vmem>>, vector<128x128xbf16>
    %cst_14 = arith.constant dense<0.000000e+00> : vector<8x128xf32>
    %19 = tpu.matmul %17, %18, %cst_14 {dimension_numbers = #tpu.dot_dimension_numbers<[1], [0], [0], [1], [0, 0, 1, 1], [], []>} : vector<8x128xbf16>, vector<128x128xbf16>, vector<8x128xf32> -> vector<8x128xf32>
    %20 = vector.extract_strided_slice %3 {offsets = [1, 0], sizes = [1, 128], strides = [1, 1]} : vector<2x128xf32> to vector<1x128xf32>
    %21 = vector.broadcast %20 : vector<1x128xf32> to vector<8x128xf32>
    %22 = arith.addf %19, %21 : vector<8x128xf32>
    %23 = arith.addf %0, %22 : vector<8x128xf32>
    %c0_15 = arith.constant 0 : index
    %c0_16 = arith.constant 0 : index
    %24 = vector.load %arg7[%c0_15, %c0_16] : memref<8x128xf32, #tpu.memory_space<vmem>>, vector<8x128xf32>
    tpu.vector_store %arg7[%c0_15, %c0_16], %23 {strides = array<i32>} : memref<8x128xf32, #tpu.memory_space<vmem>>, vector<8x128xf32>,
    return
  }
  func.func @transform_0(%arg0: i32) -> (i32, i32) {
    %c0_i32 = arith.constant 0 : i32
    %c0_i32_0 = arith.constant 0 : i32
    return %arg0, %c0_i32 : i32, i32
  }
  func.func @transform_1(%arg0: i32) -> (i32, i32) {
    %c0_i32 = arith.constant 0 : i32
    %c0_i32_0 = arith.constant 0 : i32
    return %arg0, %c0_i32 : i32, i32
  }
  func.func @transform_2(%arg0: i32) -> (i32, i32) {
    %c0_i32 = arith.constant 0 : i32
    %c0_i32_0 = arith.constant 0 : i32
    %c0_i32_1 = arith.constant 0 : i32
    return %c0_i32, %c0_i32_0 : i32, i32
  }
  func.func @transform_3(%arg0: i32) -> (i32, i32) {
    %c0_i32 = arith.constant 0 : i32
    %c0_i32_0 = arith.constant 0 : i32
    %c0_i32_1 = arith.constant 0 : i32
    return %c0_i32, %c0_i32_0 : i32, i32
  }
  func.func @transform_4(%arg0: i32) -> (i32, i32) {
    %c0_i32 = arith.constant 0 : i32
    %c0_i32_0 = arith.constant 0 : i32
    %c0_i32_1 = arith.constant 0 : i32
    return %c0_i32, %c0_i32_0 : i32, i32
  }
  func.func @transform_5(%arg0: i32) -> (i32, i32) {
    %c0_i32 = arith.constant 0 : i32
    %c0_i32_0 = arith.constant 0 : i32
    %c0_i32_1 = arith.constant 0 : i32
    return %c0_i32, %c0_i32_0 : i32, i32
  }
  func.func @transform_6(%arg0: i32) -> (i32, i32) {
    %c0_i32 = arith.constant 0 : i32
    %c0_i32_0 = arith.constant 0 : i32
    return %arg0, %c0_i32 : i32, i32
  }
}

module attributes {stable_mosaic.version = 11 : i64} {
  func.func @_masked_residual_block_kernel(%arg0: i32, %arg1: memref<8x128xf32, #tpu.memory_space<vmem>>, %arg2: memref<8x128xf32, #tpu.memory_space<vmem>>, %arg3: memref<128x128xbf16, #tpu.memory_space<vmem>>, %arg4: memref<128x128xbf16, #tpu.memory_space<vmem>>, %arg5: memref<128x128xbf16, #tpu.memory_space<vmem>>, %arg6: memref<2x128xf32, #tpu.memory_space<vmem>>, %arg7: memref<8x128xf32, #tpu.memory_space<vmem>>) attributes {dimension_semantics = [#tpu.dimension_semantics<parallel>], iteration_bounds = array<i64: 1>, scalar_prefetch = 0 : i64, scratch_operands = 0 : i64, tpu.core_type = #tpu.core_type<tc>, window_params = [{transform_indices = @transform_0, window_bounds = array<i64: 8, 128>}, {transform_indices = @transform_1, window_bounds = array<i64: 8, 128>}, {pipeline_mode = #tpu.pipeline_mode<synchronous>, transform_indices = @transform_2, window_bounds = array<i64: 128, 128>}, {pipeline_mode = #tpu.pipeline_mode<synchronous>, transform_indices = @transform_3, window_bounds = array<i64: 128, 128>}, {pipeline_mode = #tpu.pipeline_mode<synchronous>, transform_indices = @transform_4, window_bounds = array<i64: 128, 128>}, {pipeline_mode = #tpu.pipeline_mode<synchronous>, transform_indices = @transform_5, window_bounds = array<i64: 2, 128>}, {transform_indices = @transform_6, window_bounds = array<i64: 8, 128>}]} {
    %c0 = arith.constant 0 : index
    %c0_0 = arith.constant 0 : index
    %0 = vector.load %arg1[%c0, %c0_0] : memref<8x128xf32, #tpu.memory_space<vmem>>, vector<8x128xf32>
    %cst = arith.constant 0.000000e+00 : f32
    %1 = vector.broadcast %cst : f32 to vector<8x128xf32>
    %2 = arith.maximumf %0, %1 : vector<8x128xf32>
    %c0_1 = arith.constant 0 : index
    %c0_2 = arith.constant 0 : index
    %3 = vector.load %arg6[%c0_1, %c0_2] : memref<2x128xf32, #tpu.memory_space<vmem>>, vector<2x128xf32>
    %4 = arith.truncf %2 : vector<8x128xf32> to vector<8x128xbf16>
    %c0_3 = arith.constant 0 : index
    %c0_4 = arith.constant 0 : index
    %5 = vector.load %arg3[%c0_3, %c0_4] : memref<128x128xbf16, #tpu.memory_space<vmem>>, vector<128x128xbf16>
    %cst_5 = arith.constant dense<0.000000e+00> : vector<8x128xf32>
    %6 = tpu.matmul %4, %5, %cst_5 {dimension_numbers = #tpu.dot_dimension_numbers<[1], [0], [0], [1], [0, 0, 1, 1], [], []>} : vector<8x128xbf16>, vector<128x128xbf16>, vector<8x128xf32> -> vector<8x128xf32>
    %c0_6 = arith.constant 0 : index
    %c0_7 = arith.constant 0 : index
    %7 = vector.load %arg2[%c0_6, %c0_7] : memref<8x128xf32, #tpu.memory_space<vmem>>, vector<8x128xf32>
    %8 = arith.truncf %7 : vector<8x128xf32> to vector<8x128xbf16>
    %c0_8 = arith.constant 0 : index
    %c0_9 = arith.constant 0 : index
    %9 = vector.load %arg4[%c0_8, %c0_9] : memref<128x128xbf16, #tpu.memory_space<vmem>>, vector<128x128xbf16>
    %cst_10 = arith.constant dense<0.000000e+00> : vector<8x128xf32>
    %10 = tpu.matmul %8, %9, %cst_10 {dimension_numbers = #tpu.dot_dimension_numbers<[1], [0], [0], [1], [0, 0, 1, 1], [], []>} : vector<8x128xbf16>, vector<128x128xbf16>, vector<8x128xf32> -> vector<8x128xf32>
    %11 = arith.addf %6, %10 : vector<8x128xf32>
    %12 = vector.extract_strided_slice %3 {offsets = [0, 0], sizes = [1, 128], strides = [1, 1]} : vector<2x128xf32> to vector<1x128xf32>
    %13 = vector.broadcast %12 : vector<1x128xf32> to vector<8x128xf32>
    %14 = arith.addf %11, %13 : vector<8x128xf32>
    %cst_11 = arith.constant 0.000000e+00 : f32
    %15 = vector.broadcast %cst_11 : f32 to vector<8x128xf32>
    %16 = arith.maximumf %14, %15 : vector<8x128xf32>
    %17 = arith.truncf %16 : vector<8x128xf32> to vector<8x128xbf16>
    %c0_12 = arith.constant 0 : index
    %c0_13 = arith.constant 0 : index
    %18 = vector.load %arg5[%c0_12, %c0_13] : memref<128x128xbf16, #tpu.memory_space<vmem>>, vector<128x128xbf16>
    %cst_14 = arith.constant dense<0.000000e+00> : vector<8x128xf32>
    %19 = tpu.matmul %17, %18, %cst_14 {dimension_numbers = #tpu.dot_dimension_numbers<[1], [0], [0], [1], [0, 0, 1, 1], [], []>} : vector<8x128xbf16>, vector<128x128xbf16>, vector<8x128xf32> -> vector<8x128xf32>
    %20 = vector.extract_strided_slice %3 {offsets = [1, 0], sizes = [1, 128], strides = [1, 1]} : vector<2x128xf32> to vector<1x128xf32>
    %21 = vector.broadcast %20 : vector<1x128xf32> to vector<8x128xf32>
    %22 = arith.addf %19, %21 : vector<8x128xf32>
    %23 = arith.addf %0, %22 : vector<8x128xf32>
    %c0_15 = arith.constant 0 : index
    %c0_16 = arith.constant 0 : index
    %24 = vector.load %arg7[%c0_15, %c0_16] : memref<8x128xf32, #tpu.memory_space<vmem>>, vector<8x128xf32>
    tpu.vector_store %arg7[%c0_15, %c0_16], %23 {strides = array<i32>} : memref<8x128xf32, #tpu.memory_space<vmem>>, vector<8x128xf32>,
    return
  }
  func.func @transform_0(%arg0: i32) -> (i32, i32) {
    %c0_i32 = arith.constant 0 : i32
    %c0_i32_0 = arith.constant 0 : i32
    return %arg0, %c0_i32 : i32, i32
  }
  func.func @transform_1(%arg0: i32) -> (i32, i32) {
    %c0_i32 = arith.constant 0 : i32
    %c0_i32_0 = arith.constant 0 : i32
    return %arg0, %c0_i32 : i32, i32
  }
  func.func @transform_2(%arg0: i32) -> (i32, i32) {
    %c0_i32 = arith.constant 0 : i32
    %c0_i32_0 = arith.constant 0 : i32
    %c0_i32_1 = arith.constant 0 : i32
    return %c0_i32, %c0_i32_0 : i32, i32
  }
  func.func @transform_3(%arg0: i32) -> (i32, i32) {
    %c0_i32 = arith.constant 0 : i32
    %c0_i32_0 = arith.constant 0 : i32
    %c0_i32_1 = arith.constant 0 : i32
    return %c0_i32, %c0_i32_0 : i32, i32
  }
  func.func @transform_4(%arg0: i32) -> (i32, i32) {
    %c0_i32 = arith.constant 0 : i32
    %c0_i32_0 = arith.constant 0 : i32
    %c0_i32_1 = arith.constant 0 : i32
    return %c0_i32, %c0_i32_0 : i32, i32
  }
  func.func @transform_5(%arg0: i32) -> (i32, i32) {
    %c0_i32 = arith.constant 0 : i32
    %c0_i32_0 = arith.constant 0 : i32
    %c0_i32_1 = arith.constant 0 : i32
    return %c0_i32, %c0_i32_0 : i32, i32
  }
  func.func @transform_6(%arg0: i32) -> (i32, i32) {
    %c0_i32 = arith.constant 0 : i32
    %c0_i32_0 = arith.constant 0 : i32
    return %arg0, %c0_i32 : i32, i32
  }
}

</mosaic_0001>

<bundles_post_ra>
// kernel: tpu_custom_call.1
= control target key start
LH: loop header
LB: loop body
LE: loop exit
PB: predicated region body
PF: predicated region fallthrough
CT: control target
= control target key end

     0   :  { %11 = vsyncpa [#allocation3], 0  ;;  %s705_s0 = inlined_call_operand.hbm [shape: f32[8,128], index: 0, kind: input, shape index: {}]   ;;  %s706_s1 = inlined_call_operand.hbm [shape: f32[8,128], index: 1, kind: input, shape index: {}]   ;;  %s707_s2 = inlined_call_operand.hbm [shape: bf16[128,128], index: 2, kind: input, shape index: {}]   ;;  %s708_s3 = inlined_call_operand.hbm [shape: bf16[128,128], index: 3, kind: input, shape index: {}]   ;;  %s709_s4 = inlined_call_operand.hbm [shape: bf16[128,128], index: 4, kind: input, shape index: {}]   ;;  %s710_s5 = inlined_call_operand.vmem [shape: f32[2,128], index: 5, kind: input, shape index: {}]   ;;  %s711_s6 = inlined_call_operand.hbm [shape: f32[8,128], index: 6, kind: output, shape index: {}]  }
   0x1   :  { %12 = vsyncpa [#allocation6], 0 }
   0x2   :  { %13 = vsyncpa [#allocation9], 0  ;;  %s31_s23 = sshll.u32 %s706_s1, 4  ;;  %s32_s23 = int_to_ptr.hbm [resolvable:$true] %s31_s23 }
   0x3   :  { %14 = vsyncpa [#allocation4], 0  ;;  %s641_s24 = smov [#allocation5]   ;;  %s54_s28 = sshll.u32 %s708_s3, 4  ;;  %s55_s28 = int_to_ptr.hbm [resolvable:$true] %s54_s28 }
   0x4   :  { %s33_s25 = sshll.u32 %s641_s24, 4  ;;  %s642_s29 = smov [#allocation8]   ;;  %s34_s25 = int_to_ptr.vmem [resolvable:$true] %s33_s25 }
   0x5   :  { %36 = dma.hbm_to_vmem [thread:$0]  %s32_s23, 128, %s34_s25, [#allocation6]  }
   0x6   :  { %s56_s30 = sshll.u32 %s642_s29, 4  ;;  %s20_s9 = sshll.u32 %s705_s0, 4  ;;  %s57_s30 = int_to_ptr.vmem [resolvable:$true] %s56_s30  ;;  %s21_s9 = int_to_ptr.hbm [resolvable:$true] %s20_s9 }
   0x7   :  { %s643_s1 = smov 64   ;;  %s644_s10 = smov 4  }
   0x8   :  { %62 = dma.hbm_to_vmem [thread:$0]  %s55_s28, 1024, %s57_s30, [#allocation9], %s643_s1, %s643_s1, %s644_s10  }
   0x9   :  { %s41_s13 = sshll.u32 %s707_s2, 4  ;;  %s645_s14 = smov [#allocation2]   ;;  %s42_s13 = int_to_ptr.hbm [resolvable:$true] %s41_s13 }
   0xa   :  { %s22_s15 = sshll.u32 %s645_s14, 4  ;;  %s646_s3 = smov [#allocation7]   ;;  %s23_s15 = int_to_ptr.vmem [resolvable:$true] %s22_s15 }
   0xb   :  { %25 = dma.hbm_to_vmem [thread:$0]  %s21_s9, 128, %s23_s15, [#allocation3]  }
   0xc   :  { %s43_s16 = sshll.u32 %s646_s3, 4  ;;  %s67_s0 = sshll.u32 %s709_s4, 4  ;;  %s44_s16 = int_to_ptr.vmem [resolvable:$true] %s43_s16  ;;  %s68_s0 = int_to_ptr.hbm [resolvable:$true] %s67_s0 }
   0xd   :  { %49 = dma.hbm_to_vmem [thread:$0]  %s42_s13, 1024, %s44_s16, [#allocation6], %s643_s1, %s643_s1, %s644_s10  }
   0xe   :  { %s647_s19 = smov [#allocation10]  }
   0xf   :  { %s69_s20 = sshll.u32 %s647_s19, 4  ;;  %s70_s20 = int_to_ptr.vmem [resolvable:$true] %s69_s20 }
  0x10   :  { %75 = dma.hbm_to_vmem [thread:$0]  %s68_s0, 1024, %s70_s20, [#allocation9], %s643_s1, %s643_s1, %s644_s10  }
  0x11   :  { %633 = dma.done.wait [#allocation3], 128  }
  0x12   :  { %634 = vsyncadd [#allocation3], 4294967168 }
  0x13   :  { %635 = dma.done.wait [#allocation6], 1152  }
  0x14   :  { %636 = vsyncadd [#allocation6], 4294966144 }
  0x15   :  { %637 = dma.done.wait [#allocation9], 2048  }
  0x16   :  { %638 = vsyncadd [#allocation9], 4294965248  ;;  %v472_v0 = vld [vmem:[#allocation8 + $0x38] sm:$0xff]  ;;  %v471_v2 = vld [vmem:[#allocation8 + $0x30] sm:$0xff]  ;;  %s648_s21 = smov [#allocation11]   ;;  %s349_s25 = sshll.u32 %s711_s6, 4  ;;  %s350_s25 = int_to_ptr.hbm [resolvable:$true] %s349_s25 }
  0x17   :  { %v464_v1 = vld [vmem:[#allocation7 + $0x38] sm:$0xff]  ;;  %184 = vmatpush.bf16.msra.mxu0 %v472_v0  ;;  %v463_v3 = vld [vmem:[#allocation7 + $0x30] sm:$0xff]  ;;  %v470_v4 = vld [vmem:[#allocation8 + $0x28] sm:$0xff]  ;;  %s347_s22 = sshll.u32 %s648_s21, 4  ;;  %s348_s22 = int_to_ptr.vmem [resolvable:$true] %s347_s22 }
  0x18   :  { %245 = vmatpush.bf16.msra.mxu1 %v464_v1  ;;  %v462_v5 = vld [vmem:[#allocation7 + $0x28] sm:$0xff]  ;;  %v480_v6 = vld [vmem:[#allocation10 + $0x38] sm:$0xff]  ;;  %v479_v7 = vld [vmem:[#allocation10 + $0x30] sm:$0xff] }
  0x19   :  { %327 = vmatpush.bf16.msra.mxu2 %v480_v6  ;;  %v469_v8 = vld [vmem:[#allocation8 + $0x20] sm:$0xff]  ;;  %v478_v10 = vld [vmem:[#allocation10 + $0x28] sm:$0xff]  ;;  %v468_v11 = vld [vmem:[#allocation8 + $0x18] sm:$0xff] }
  0x1a   :  { %v461_v9 = vld [vmem:[#allocation7 + $0x20] sm:$0xff]  ;;  %v460_v12 = vld [vmem:[#allocation7 + $0x18] sm:$0xff]  ;;  %v467_v14 = vld [vmem:[#allocation8 + $0x10] sm:$0xff] }
  0x1b   :  { %185 = vmatpush.bf16.msra.mxu0 %v471_v2  ;;  %v477_v13 = vld [vmem:[#allocation10 + $0x20] sm:$0xff]  ;;  %v459_v15 = vld [vmem:[#allocation7 + $0x10] sm:$0xff]  ;;  %v476_v16 = vld [vmem:[#allocation10 + $0x18] sm:$0xff] }
  0x1c   :  { %246 = vmatpush.bf16.msra.mxu1 %v463_v3  ;;  %v466_v17 = vld [vmem:[#allocation8 + $0x8] sm:$0xff]  ;;  %v98_v19 = vld [vmem:[#allocation2] sm:$0xff]  ;;  %v465_v22 = vld [vmem:[#allocation8] sm:$0xff] }
  0x1d   :  { %328 = vmatpush.bf16.msra.mxu2 %v479_v7  ;;  %v458_v18 = vld [vmem:[#allocation7 + $0x8] sm:$0xff]  ;;  %v475_v20 = vld [vmem:[#allocation10 + $0x10] sm:$0xff]  ;;  %v99_v21 = vmax.f32 %v98_v19, 0.0  ;;  %v457_v23 = vld [vmem:[#allocation7] sm:$0xff] }
  0x1e   :  { %v118_v24 = vld [vmem:[#allocation5] sm:$0xff]  ;;  %v474_v27 = vld [vmem:[#allocation10 + $0x8] sm:$0xff]  ;;  %v473_v28 = vld [vmem:[#allocation10] sm:$0xff] }
  0x1f   :  { %186 = vmatpush.bf16.msra.mxu0 %v470_v4  ;;  %v119_v25 = vpack.c.bf16 %v118_v24, %v118_v24  ;;  %v101_v26 = vpack.c.bf16 %v99_v21, %v99_v21  ;;  %v100_v29 = vld [vmem:[%s710_s5] sm:$0x3] }
  0x20   :  { %247 = vmatpush.bf16.msra.mxu1 %v462_v5  ;;  %v258_v30 = vperm.slane %v100_v29, 0  ;;  %v278_v39 = vperm.slane %v100_v29, 1 }
  0x21   :  { %329 = vmatpush.bf16.msra.mxu2 %v478_v10 }
  0x23   :  { %187 = vmatpush.bf16.msra.mxu0 %v469_v8 }
  0x24   :  { %248 = vmatpush.bf16.msra.mxu1 %v461_v9 }
  0x25   :  { %330 = vmatpush.bf16.msra.mxu2 %v477_v13 }
  0x27   :  { %188 = vmatpush.bf16.msra.mxu0 %v468_v11 }
  0x28   :  { %249 = vmatpush.bf16.msra.mxu1 %v460_v12 }
  0x29   :  { %331 = vmatpush.bf16.msra.mxu2 %v476_v16 }
  0x2b   :  { %189 = vmatpush.bf16.msra.mxu0 %v467_v14 }
  0x2c   :  { %250 = vmatpush.bf16.msra.mxu1 %v459_v15 }
  0x2d   :  { %332 = vmatpush.bf16.msra.mxu2 %v475_v20 }
  0x2f   :  { %190 = vmatpush.bf16.msra.mxu0 %v466_v17 }
  0x30   :  { %251 = vmatpush.bf16.msra.mxu1 %v458_v18 }
  0x31   :  { %333 = vmatpush.bf16.msra.mxu2 %v474_v27 }
  0x33   :  { %191 = vmatpush.bf16.msra.mxu0 %v465_v22 }
  0x34   :  { %252 = vmatpush.bf16.msra.mxu1 %v457_v23 }
  0x35   :  { %334 = vmatpush.bf16.msra.mxu2 %v473_v28 }
  0x36   :  { %192 = vmatmul.bf16.vlgmr.msra.gmra.mxu0 %v119_v25 }
  0x37   :  { %253 = vmatmul.bf16.vlgmr.msra.gmra.mxu1 %v101_v26 }
  0xb3   :  { %v193_v31 = vpop.f32.mrf.mxu0 }
  0xb4   :  { %v254_v32 = vpop.f32.mrf.mxu1 }
  0xb5   :  { %v255_v33 = vadd.f32 %v254_v32, %v193_v31 }
  0xb7   :  { %v259_v34 = vadd.f32 %v258_v30, %v255_v33 }
  0xb9   :  { %v260_v35 = vmax.f32 %v259_v34, 0.0 }
  0xbb   :  { %v261_v36 = vpack.c.bf16 %v260_v35, %v260_v35  ;;  %v195_v37 = vpop.f32.mrf.mxu0 }
  0xbc   :  { %v256_v38 = vpop.f32.mrf.mxu1 }
  0xbd   :  { %335 = vmatmul.bf16.vlgmr.msra.gmra.mxu2 %v261_v36 }
 0x140   :  { %v336_v40 = vpop.f32.mrf.mxu2 }
 0x141   :  { %v337_v41 = vadd.f32 %v336_v40, %v278_v39 }
 0x143   :  { %v340_v42 = vadd.f32 %v337_v41, %v98_v19 }
 0x145   :  { %341 = vst [vmem:[#allocation11] sm:$0xff] %v340_v42 }
 0x146   :  { %352 = dma.vmem_to_hbm [thread:$0]  %s348_s22, 128, %s350_s25, [#allocation4]  }
 0x148   :  { %v338_v43 = vpop.f32.mrf.mxu2 }
 0x149   :  { %639 = dma.done.wait [#allocation4], 128  }
 0x14a   :  { %640 = vsyncadd [#allocation4], 4294967168 }
 0x14b   :  { %357 = vsyncpa [#allocation3], 1 }
 0x14c   :  { %358 = vsyncpa [#allocation6], 1 }
 0x14d   :  { %359 = vsyncpa [#allocation9], 1 }
 0x14e   :  { %360 = vsyncpa [#allocation4], 1 }

// kernel: tpu_custom_call.1
= control target key start
LH: loop header
LB: loop body
LE: loop exit
PB: predicated region body
PF: predicated region fallthrough
CT: control target
= control target key end

     0   :  { %11 = vsyncpa [#allocation3], 0  ;;  %s705_s0 = inlined_call_operand.hbm [shape: f32[8,128], index: 0, kind: input, shape index: {}]   ;;  %s706_s1 = inlined_call_operand.hbm [shape: f32[8,128], index: 1, kind: input, shape index: {}]   ;;  %s707_s2 = inlined_call_operand.hbm [shape: bf16[128,128], index: 2, kind: input, shape index: {}]   ;;  %s708_s3 = inlined_call_operand.hbm [shape: bf16[128,128], index: 3, kind: input, shape index: {}]   ;;  %s709_s4 = inlined_call_operand.hbm [shape: bf16[128,128], index: 4, kind: input, shape index: {}]   ;;  %s710_s5 = inlined_call_operand.vmem [shape: f32[2,128], index: 5, kind: input, shape index: {}]   ;;  %s711_s6 = inlined_call_operand.hbm [shape: f32[8,128], index: 6, kind: output, shape index: {}]  }
   0x1   :  { %12 = vsyncpa [#allocation6], 0 }
   0x2   :  { %13 = vsyncpa [#allocation9], 0  ;;  %s31_s23 = sshll.u32 %s706_s1, 4  ;;  %s32_s23 = int_to_ptr.hbm [resolvable:$true] %s31_s23 }
   0x3   :  { %14 = vsyncpa [#allocation4], 0  ;;  %s641_s24 = smov [#allocation5]   ;;  %s54_s28 = sshll.u32 %s708_s3, 4  ;;  %s55_s28 = int_to_ptr.hbm [resolvable:$true] %s54_s28 }
   0x4   :  { %s33_s25 = sshll.u32 %s641_s24, 4  ;;  %s642_s29 = smov [#allocation8]   ;;  %s34_s25 = int_to_ptr.vmem [resolvable:$true] %s33_s25 }
   0x5   :  { %36 = dma.hbm_to_vmem [thread:$0]  %s32_s23, 128, %s34_s25, [#allocation6]  }
   0x6   :  { %s56_s30 = sshll.u32 %s642_s29, 4  ;;  %s20_s9 = sshll.u32 %s705_s0, 4  ;;  %s57_s30 = int_to_ptr.vmem [resolvable:$true] %s56_s30  ;;  %s21_s9 = int_to_ptr.hbm [resolvable:$true] %s20_s9 }
   0x7   :  { %s643_s1 = smov 64   ;;  %s644_s10 = smov 4  }
   0x8   :  { %62 = dma.hbm_to_vmem [thread:$0]  %s55_s28, 1024, %s57_s30, [#allocation9], %s643_s1, %s643_s1, %s644_s10  }
   0x9   :  { %s41_s13 = sshll.u32 %s707_s2, 4  ;;  %s645_s14 = smov [#allocation2]   ;;  %s42_s13 = int_to_ptr.hbm [resolvable:$true] %s41_s13 }
   0xa   :  { %s22_s15 = sshll.u32 %s645_s14, 4  ;;  %s646_s3 = smov [#allocation7]   ;;  %s23_s15 = int_to_ptr.vmem [resolvable:$true] %s22_s15 }
   0xb   :  { %25 = dma.hbm_to_vmem [thread:$0]  %s21_s9, 128, %s23_s15, [#allocation3]  }
   0xc   :  { %s43_s16 = sshll.u32 %s646_s3, 4  ;;  %s67_s0 = sshll.u32 %s709_s4, 4  ;;  %s44_s16 = int_to_ptr.vmem [resolvable:$true] %s43_s16  ;;  %s68_s0 = int_to_ptr.hbm [resolvable:$true] %s67_s0 }
   0xd   :  { %49 = dma.hbm_to_vmem [thread:$0]  %s42_s13, 1024, %s44_s16, [#allocation6], %s643_s1, %s643_s1, %s644_s10  }
   0xe   :  { %s647_s19 = smov [#allocation10]  }
   0xf   :  { %s69_s20 = sshll.u32 %s647_s19, 4  ;;  %s70_s20 = int_to_ptr.vmem [resolvable:$true] %s69_s20 }
  0x10   :  { %75 = dma.hbm_to_vmem [thread:$0]  %s68_s0, 1024, %s70_s20, [#allocation9], %s643_s1, %s643_s1, %s644_s10  }
  0x11   :  { %633 = dma.done.wait [#allocation3], 128  }
  0x12   :  { %634 = vsyncadd [#allocation3], 4294967168 }
  0x13   :  { %635 = dma.done.wait [#allocation6], 1152  }
  0x14   :  { %636 = vsyncadd [#allocation6], 4294966144 }
  0x15   :  { %637 = dma.done.wait [#allocation9], 2048  }
  0x16   :  { %638 = vsyncadd [#allocation9], 4294965248  ;;  %v472_v0 = vld [vmem:[#allocation8 + $0x38] sm:$0xff]  ;;  %v471_v2 = vld [vmem:[#allocation8 + $0x30] sm:$0xff]  ;;  %s648_s21 = smov [#allocation11]   ;;  %s349_s25 = sshll.u32 %s711_s6, 4  ;;  %s350_s25 = int_to_ptr.hbm [resolvable:$true] %s349_s25 }
  0x17   :  { %v464_v1 = vld [vmem:[#allocation7 + $0x38] sm:$0xff]  ;;  %184 = vmatpush.bf16.msra.mxu0 %v472_v0  ;;  %v463_v3 = vld [vmem:[#allocation7 + $0x30] sm:$0xff]  ;;  %v470_v4 = vld [vmem:[#allocation8 + $0x28] sm:$0xff]  ;;  %s347_s22 = sshll.u32 %s648_s21, 4  ;;  %s348_s22 = int_to_ptr.vmem [resolvable:$true] %s347_s22 }
  0x18   :  { %245 = vmatpush.bf16.msra.mxu1 %v464_v1  ;;  %v462_v5 = vld [vmem:[#allocation7 + $0x28] sm:$0xff]  ;;  %v480_v6 = vld [vmem:[#allocation10 + $0x38] sm:$0xff]  ;;  %v479_v7 = vld [vmem:[#allocation10 + $0x30] sm:$0xff] }
  0x19   :  { %327 = vmatpush.bf16.msra.mxu2 %v480_v6  ;;  %v469_v8 = vld [vmem:[#allocation8 + $0x20] sm:$0xff]  ;;  %v478_v10 = vld [vmem:[#allocation10 + $0x28] sm:$0xff]  ;;  %v468_v11 = vld [vmem:[#allocation8 + $0x18] sm:$0xff] }
  0x1a   :  { %v461_v9 = vld [vmem:[#allocation7 + $0x20] sm:$0xff]  ;;  %v460_v12 = vld [vmem:[#allocation7 + $0x18] sm:$0xff]  ;;  %v467_v14 = vld [vmem:[#allocation8 + $0x10] sm:$0xff] }
  0x1b   :  { %185 = vmatpush.bf16.msra.mxu0 %v471_v2  ;;  %v477_v13 = vld [vmem:[#allocation10 + $0x20] sm:$0xff]  ;;  %v459_v15 = vld [vmem:[#allocation7 + $0x10] sm:$0xff]  ;;  %v476_v16 = vld [vmem:[#allocation10 + $0x18] sm:$0xff] }
  0x1c   :  { %246 = vmatpush.bf16.msra.mxu1 %v463_v3  ;;  %v466_v17 = vld [vmem:[#allocation8 + $0x8] sm:$0xff]  ;;  %v98_v19 = vld [vmem:[#allocation2] sm:$0xff]  ;;  %v465_v22 = vld [vmem:[#allocation8] sm:$0xff] }
  0x1d   :  { %328 = vmatpush.bf16.msra.mxu2 %v479_v7  ;;  %v458_v18 = vld [vmem:[#allocation7 + $0x8] sm:$0xff]  ;;  %v475_v20 = vld [vmem:[#allocation10 + $0x10] sm:$0xff]  ;;  %v99_v21 = vmax.f32 %v98_v19, 0.0  ;;  %v457_v23 = vld [vmem:[#allocation7] sm:$0xff] }
  0x1e   :  { %v118_v24 = vld [vmem:[#allocation5] sm:$0xff]  ;;  %v474_v27 = vld [vmem:[#allocation10 + $0x8] sm:$0xff]  ;;  %v473_v28 = vld [vmem:[#allocation10] sm:$0xff] }
  0x1f   :  { %186 = vmatpush.bf16.msra.mxu0 %v470_v4  ;;  %v119_v25 = vpack.c.bf16 %v118_v24, %v118_v24  ;;  %v101_v26 = vpack.c.bf16 %v99_v21, %v99_v21  ;;  %v100_v29 = vld [vmem:[%s710_s5] sm:$0x3] }
  0x20   :  { %247 = vmatpush.bf16.msra.mxu1 %v462_v5  ;;  %v258_v30 = vperm.slane %v100_v29, 0  ;;  %v278_v39 = vperm.slane %v100_v29, 1 }
  0x21   :  { %329 = vmatpush.bf16.msra.mxu2 %v478_v10 }
  0x23   :  { %187 = vmatpush.bf16.msra.mxu0 %v469_v8 }
  0x24   :  { %248 = vmatpush.bf16.msra.mxu1 %v461_v9 }
  0x25   :  { %330 = vmatpush.bf16.msra.mxu2 %v477_v13 }
  0x27   :  { %188 = vmatpush.bf16.msra.mxu0 %v468_v11 }
  0x28   :  { %249 = vmatpush.bf16.msra.mxu1 %v460_v12 }
  0x29   :  { %331 = vmatpush.bf16.msra.mxu2 %v476_v16 }
  0x2b   :  { %189 = vmatpush.bf16.msra.mxu0 %v467_v14 }
  0x2c   :  { %250 = vmatpush.bf16.msra.mxu1 %v459_v15 }
  0x2d   :  { %332 = vmatpush.bf16.msra.mxu2 %v475_v20 }
  0x2f   :  { %190 = vmatpush.bf16.msra.mxu0 %v466_v17 }
  0x30   :  { %251 = vmatpush.bf16.msra.mxu1 %v458_v18 }
  0x31   :  { %333 = vmatpush.bf16.msra.mxu2 %v474_v27 }
  0x33   :  { %191 = vmatpush.bf16.msra.mxu0 %v465_v22 }
  0x34   :  { %252 = vmatpush.bf16.msra.mxu1 %v457_v23 }
  0x35   :  { %334 = vmatpush.bf16.msra.mxu2 %v473_v28 }
  0x36   :  { %192 = vmatmul.bf16.vlgmr.msra.gmra.mxu0 %v119_v25 }
  0x37   :  { %253 = vmatmul.bf16.vlgmr.msra.gmra.mxu1 %v101_v26 }
  0xb3   :  { %v193_v31 = vpop.f32.mrf.mxu0 }
  0xb4   :  { %v254_v32 = vpop.f32.mrf.mxu1 }
  0xb5   :  { %v255_v33 = vadd.f32 %v254_v32, %v193_v31 }
  0xb7   :  { %v259_v34 = vadd.f32 %v258_v30, %v255_v33 }
  0xb9   :  { %v260_v35 = vmax.f32 %v259_v34, 0.0 }
  0xbb   :  { %v261_v36 = vpack.c.bf16 %v260_v35, %v260_v35  ;;  %v195_v37 = vpop.f32.mrf.mxu0 }
  0xbc   :  { %v256_v38 = vpop.f32.mrf.mxu1 }
  0xbd   :  { %335 = vmatmul.bf16.vlgmr.msra.gmra.mxu2 %v261_v36 }
 0x140   :  { %v336_v40 = vpop.f32.mrf.mxu2 }
 0x141   :  { %v337_v41 = vadd.f32 %v336_v40, %v278_v39 }
 0x143   :  { %v340_v42 = vadd.f32 %v337_v41, %v98_v19 }
 0x145   :  { %341 = vst [vmem:[#allocation11] sm:$0xff] %v340_v42 }
 0x146   :  { %352 = dma.vmem_to_hbm [thread:$0]  %s348_s22, 128, %s350_s25, [#allocation4]  }
 0x148   :  { %v338_v43 = vpop.f32.mrf.mxu2 }
 0x149   :  { %639 = dma.done.wait [#allocation4], 128  }
 0x14a   :  { %640 = vsyncadd [#allocation4], 4294967168 }
 0x14b   :  { %357 = vsyncpa [#allocation3], 1 }
 0x14c   :  { %358 = vsyncpa [#allocation6], 1 }
 0x14d   :  { %359 = vsyncpa [#allocation9], 1 }
 0x14e   :  { %360 = vsyncpa [#allocation4], 1 }

</bundles_post_ra>
